<compile_context>
chip_gen: v7x
topology: tpu7x:2x2x1
jax: 0.10.0
libtpu: 0.0.40
codegen_flags: <defaults>
</compile_context>

<pallas_src>
import functools

import numpy as np
import jax
import jax.numpy as jnp
from jax import lax
from jax.experimental import pallas as pl
from jax.experimental.pallas import tpu as pltpu


# ---------------------------------------------------------------------------
# Fused BasicBlock kernel (one grid step per batch sample)
# ---------------------------------------------------------------------------
def _basic_block_kernel(x_ref, masks_ref, w1_ref, b1_ref, w2_ref, b2_ref,
                        o_ref, *, H, W, has_proj):
    HW = H * W
    x = x_ref[0]                                     # (Cin, HW) float32
    masks = [masks_ref[k] for k in range(9)]         # each (1, HW), 0/1

    def im2row(inp):
        """(C, HW) -> (9*C, HW): 9 shifted+masked taps stacked on sublanes."""
        inp2 = jnp.concatenate([inp, inp], axis=1)   # (C, 2*HW) for lane shifts
        pieces = []
        for kh in range(3):
            for kw in range(3):
                k = kh * 3 + kw
                off = (kh - 1) * W + (kw - 1)
                if off == 0:
                    pieces.append(inp)               # center tap (mask all-ones)
                else:
                    s = off % HW
                    # static lane-dim slice of the self-concat == lane rotation;
                    # boundary mask reproduces zero padding exactly.
                    pieces.append(inp2[:, s:s + HW] * masks[k])
        return jnp.concatenate(pieces, axis=0)       # (9*C, HW)

    # conv1 (+ folded BN1 scale) -> bias -> ReLU : one fat-K MXU dot.
    out1 = jnp.dot(w1_ref[...], im2row(x), preferred_element_type=jnp.float32)
    out1 = jnp.maximum(out1 + b1_ref[...], 0.0)      # (planes, HW), stays in VMEM

    # conv2 (+ folded BN2 scale) [+ fused 1x1 projection shortcut] -> bias.
    p2 = im2row(out1)                                # (9*planes, HW)
    if has_proj:
        p2 = jnp.concatenate([p2, x], axis=0)        # append shortcut input rows
    out = jnp.dot(w2_ref[...], p2, preferred_element_type=jnp.float32) + b2_ref[...]
    if not has_proj:
        out = out + x                                # identity shortcut

    o_ref[0] = jnp.maximum(out, 0.0)                 # (planes, HW), lane-dense store


# ---------------------------------------------------------------------------
# Wrapper: BN folding into weights, weight re-layout, mask table, pallas_call
# ---------------------------------------------------------------------------
def _fold_bn(gamma, beta, mean, var, eps=1e-5):
    scale = (gamma / jnp.sqrt(var + eps)).astype(jnp.float32)
    bias = (beta - mean * scale).astype(jnp.float32)
    return scale, bias


def _tap_masks(H, W):
    """(9, 1, H*W) 0/1 masks reproducing zero padding for each 3x3 tap."""
    HW = H * W
    row, col = np.arange(HW) // W, np.arange(HW) % W
    m = []
    for kh in range(3):
        for kw in range(3):
            dh, dw = kh - 1, kw - 1
            valid = ((row + dh >= 0) & (row + dh < H) &
                     (col + dw >= 0) & (col + dw < W))
            m.append(valid.astype(np.float32))
    return jnp.asarray(np.stack(m, 0).reshape(9, 1, HW))


def basic_block_forward(x_nchw, w1, bn1, w2, bn2, w_sc=None, bn_sc=None):
    """BasicBlock forward (stride=1, use_cbam=False). NCHW in / NCHW out.

    w1: (planes, in_planes, 3, 3), w2: (planes, planes, 3, 3)  (PyTorch OIHW)
    w_sc: (planes, in_planes, 1, 1) or None;  bn*: (gamma, beta, mean, var).
    BatchNorm is inference-mode (running stats folded into weights/bias).
    """
    N, Cin, H, W = x_nchw.shape
    planes = w1.shape[0]
    HW = H * W
    has_proj = w_sc is not None

    x = x_nchw.reshape(N, Cin, HW).astype(jnp.float32)   # free reshape, stays NCHW

    s1, b1 = _fold_bn(*bn1)
    s2, b2 = _fold_bn(*bn2)

    # OIHW -> (O, kh, kw, I) -> (O, 9*I), matching the im2row row order
    # (k*C + ci, k = kh*3 + kw).  BN scale folded into the weight rows.
    w1_fat = (jnp.transpose(w1, (0, 2, 3, 1)).reshape(planes, 9 * Cin)
              .astype(jnp.float32) * s1[:, None])
    w2_fat = (jnp.transpose(w2, (0, 2, 3, 1)).reshape(planes, 9 * planes)
              .astype(jnp.float32) * s2[:, None])

    if has_proj:
        ssc, bsc = _fold_bn(*bn_sc)
        wsc_fat = w_sc.reshape(planes, Cin).astype(jnp.float32) * ssc[:, None]
        w2_full = jnp.concatenate([w2_fat, wsc_fat], axis=1)   # (planes, 9*planes+Cin)
        b2_full = b2 + bsc
    else:
        w2_full = w2_fat
        b2_full = b2
    K2 = w2_full.shape[1]

    masks = _tap_masks(H, W)

    kern = functools.partial(_basic_block_kernel, H=H, W=W, has_proj=has_proj)
    out = pl.pallas_call(
        kern,
        out_shape=jax.ShapeDtypeStruct((N, planes, HW), jnp.float32),
        grid=(N,),
        in_specs=[
            pl.BlockSpec((1, Cin, HW), lambda b: (b, 0, 0)),      # x (per sample)
            pl.BlockSpec((9, 1, HW), lambda b: (0, 0, 0)),        # tap masks
            pl.BlockSpec((planes, 9 * Cin), lambda b: (0, 0)),    # conv1 weights (BN-folded)
            pl.BlockSpec((planes, 1), lambda b: (0, 0)),          # bn1 bias
            pl.BlockSpec((planes, K2), lambda b: (0, 0)),         # conv2 [+shortcut] weights
            pl.BlockSpec((planes, 1), lambda b: (0, 0)),          # bn2 (+shortcut bn) bias
        ],
        out_specs=pl.BlockSpec((1, planes, HW), lambda b: (b, 0, 0)),
        compiler_params=pltpu.CompilerParams(
            dimension_semantics=("parallel",)),
    )(x, masks, w1_fat, b1.reshape(planes, 1), w2_full, b2_full.reshape(planes, 1))
    return out.reshape(N, planes, H, W)


# ---------------------------------------------------------------------------
# Pure-JAX reference (for correctness check)
# ---------------------------------------------------------------------------
def reference_forward(x, w1, bn1, w2, bn2, w_sc=None, bn_sc=None, eps=1e-5):
    def bn(y, p):
        gamma, beta, mean, var = (a.reshape(1, -1, 1, 1) for a in p)
        return (y - mean) / jnp.sqrt(var + eps) * gamma + beta

    dn = ('NCHW', 'OIHW', 'NCHW')
    o = lax.conv_general_dilated(x, w1, (1, 1), 'SAME', dimension_numbers=dn)
    o = jax.nn.relu(bn(o, bn1))
    o = lax.conv_general_dilated(o, w2, (1, 1), 'SAME', dimension_numbers=dn)
    o = bn(o, bn2)
    if w_sc is not None:
        sc = bn(lax.conv_general_dilated(x, w_sc, (1, 1), 'SAME',
                                         dimension_numbers=dn), bn_sc)
    else:
        sc = x
    return jax.nn.relu(o + sc)


if __name__ == "__main__":
    key = jax.random.PRNGKey(0)
    N, Cin, H, W = 2, 4, 16, 16
    planes = 8
    keys = jax.random.split(key, 10)

    def bn_params(k, c):
        k1, k2, k3, k4 = jax.random.split(k, 4)
        gamma = 1.0 + 0.1 * jax.random.normal(k1, (c,), jnp.float32)
        beta = 0.1 * jax.random.normal(k2, (c,), jnp.float32)
        mean = 0.1 * jax.random.normal(k3, (c,), jnp.float32)
        var = jnp.abs(jax.random.normal(k4, (c,), jnp.float32)) + 0.5
        return gamma, beta, mean, var

    x = jax.random.normal(keys[0], (N, Cin, H, W), jnp.float32)
    w1 = 0.1 * jax.random.normal(keys[1], (planes, Cin, 3, 3), jnp.float32)
    w2 = 0.1 * jax.random.normal(keys[2], (planes, planes, 3, 3), jnp.float32)
    w_sc = 0.1 * jax.random.normal(keys[3], (planes, Cin, 1, 1), jnp.float32)
    bn1 = bn_params(keys[4], planes)
    bn2 = bn_params(keys[5], planes)
    bn_sc = bn_params(keys[6], planes)

    # Projection-shortcut path (in_planes != planes).
    out = jax.block_until_ready(
        basic_block_forward(x, w1, bn1, w2, bn2, w_sc, bn_sc))
    ref = reference_forward(x, w1, bn1, w2, bn2, w_sc, bn_sc)
    assert out.shape == (N, planes, H, W), out.shape
    assert jnp.allclose(out, ref, atol=1e-4, rtol=1e-4), \
        float(jnp.abs(out - ref).max())

    # Identity-shortcut path (in_planes == planes).
    x2 = jax.random.normal(keys[7], (N, planes, H, W), jnp.float32)
    w1b = 0.1 * jax.random.normal(keys[8], (planes, planes, 3, 3), jnp.float32)
    bn1b = bn_params(keys[9], planes)
    out2 = jax.block_until_ready(basic_block_forward(x2, w1b, bn1b, w2, bn2))
    ref2 = reference_forward(x2, w1b, bn1b, w2, bn2)
    assert jnp.allclose(out2, ref2, atol=1e-4, rtol=1e-4), \
        float(jnp.abs(out2 - ref2).max())

    print("KERNEL_OK")
</pallas_src>

<mosaic_0001>
module attributes {stable_mosaic.version = 11 : i64} {
  func.func @_basic_block_kernel(%arg0: i32, %arg1: memref<1x4x256xf32, #tpu.memory_space<vmem>>, %arg2: memref<9x1x256xf32, #tpu.memory_space<vmem>>, %arg3: memref<8x36xf32, #tpu.memory_space<vmem>>, %arg4: memref<8x1xf32, #tpu.memory_space<vmem>>, %arg5: memref<8x76xf32, #tpu.memory_space<vmem>>, %arg6: memref<8x1xf32, #tpu.memory_space<vmem>>, %arg7: memref<1x8x256xf32, #tpu.memory_space<vmem>>) attributes {dimension_semantics = [#tpu.dimension_semantics<parallel>], iteration_bounds = array<i64: 2>, scalar_prefetch = 0 : i64, scratch_operands = 0 : i64, tpu.core_type = #tpu.core_type<tc>, window_params = [{transform_indices = @transform_0, window_bounds = array<i64: 1, 4, 256>}, {pipeline_mode = #tpu.pipeline_mode<synchronous>, transform_indices = @transform_1, window_bounds = array<i64: 9, 1, 256>}, {pipeline_mode = #tpu.pipeline_mode<synchronous>, transform_indices = @transform_2, window_bounds = array<i64: 8, 36>}, {pipeline_mode = #tpu.pipeline_mode<synchronous>, transform_indices = @transform_3, window_bounds = array<i64: 8, 1>}, {pipeline_mode = #tpu.pipeline_mode<synchronous>, transform_indices = @transform_4, window_bounds = array<i64: 8, 76>}, {pipeline_mode = #tpu.pipeline_mode<synchronous>, transform_indices = @transform_5, window_bounds = array<i64: 8, 1>}, {transform_indices = @transform_6, window_bounds = array<i64: 1, 8, 256>}]} {
    %c0 = arith.constant 0 : index
    %c0_0 = arith.constant 0 : index
    %c0_1 = arith.constant 0 : index
    %0 = vector.load %arg1[%c0, %c0_0, %c0_1] : memref<1x4x256xf32, #tpu.memory_space<vmem>>, vector<1x4x256xf32>
    %1 = vector.shape_cast %0 : vector<1x4x256xf32> to vector<4x256xf32>
    %c0_2 = arith.constant 0 : index
    %c0_3 = arith.constant 0 : index
    %c0_4 = arith.constant 0 : index
    %2 = vector.load %arg2[%c0_2, %c0_3, %c0_4] : memref<9x1x256xf32, #tpu.memory_space<vmem>>, vector<1x1x256xf32>
    %3 = vector.shape_cast %2 : vector<1x1x256xf32> to vector<1x256xf32>
    %c1 = arith.constant 1 : index
    %c0_5 = arith.constant 0 : index
    %c0_6 = arith.constant 0 : index
    %4 = vector.load %arg2[%c1, %c0_5, %c0_6] : memref<9x1x256xf32, #tpu.memory_space<vmem>>, vector<1x1x256xf32>
    %5 = vector.shape_cast %4 : vector<1x1x256xf32> to vector<1x256xf32>
    %c2 = arith.constant 2 : index
    %c0_7 = arith.constant 0 : index
    %c0_8 = arith.constant 0 : index
    %6 = vector.load %arg2[%c2, %c0_7, %c0_8] : memref<9x1x256xf32, #tpu.memory_space<vmem>>, vector<1x1x256xf32>
    %7 = vector.shape_cast %6 : vector<1x1x256xf32> to vector<1x256xf32>
    %c3 = arith.constant 3 : index
    %c0_9 = arith.constant 0 : index
    %c0_10 = arith.constant 0 : index
    %8 = vector.load %arg2[%c3, %c0_9, %c0_10] : memref<9x1x256xf32, #tpu.memory_space<vmem>>, vector<1x1x256xf32>
    %9 = vector.shape_cast %8 : vector<1x1x256xf32> to vector<1x256xf32>
    %c5 = arith.constant 5 : index
    %c0_11 = arith.constant 0 : index
    %c0_12 = arith.constant 0 : index
    %10 = vector.load %arg2[%c5, %c0_11, %c0_12] : memref<9x1x256xf32, #tpu.memory_space<vmem>>, vector<1x1x256xf32>
    %11 = vector.shape_cast %10 : vector<1x1x256xf32> to vector<1x256xf32>
    %c6 = arith.constant 6 : index
    %c0_13 = arith.constant 0 : index
    %c0_14 = arith.constant 0 : index
    %12 = vector.load %arg2[%c6, %c0_13, %c0_14] : memref<9x1x256xf32, #tpu.memory_space<vmem>>, vector<1x1x256xf32>
    %13 = vector.shape_cast %12 : vector<1x1x256xf32> to vector<1x256xf32>
    %c7 = arith.constant 7 : index
    %c0_15 = arith.constant 0 : index
    %c0_16 = arith.constant 0 : index
    %14 = vector.load %arg2[%c7, %c0_15, %c0_16] : memref<9x1x256xf32, #tpu.memory_space<vmem>>, vector<1x1x256xf32>
    %15 = vector.shape_cast %14 : vector<1x1x256xf32> to vector<1x256xf32>
    %c8 = arith.constant 8 : index
    %c0_17 = arith.constant 0 : index
    %c0_18 = arith.constant 0 : index
    %16 = vector.load %arg2[%c8, %c0_17, %c0_18] : memref<9x1x256xf32, #tpu.memory_space<vmem>>, vector<1x1x256xf32>
    %17 = vector.shape_cast %16 : vector<1x1x256xf32> to vector<1x256xf32>
    %c0_19 = arith.constant 0 : index
    %c0_20 = arith.constant 0 : index
    %18 = vector.load %arg3[%c0_19, %c0_20] : memref<8x36xf32, #tpu.memory_space<vmem>>, vector<8x36xf32>
    %19 = tpu.concatenate %1, %1 in 1 : vector<4x256xf32>, vector<4x256xf32> -> vector<4x512xf32>
    %20 = vector.extract_strided_slice %19 {offsets = [0, 239], sizes = [4, 256], strides = [1, 1]} : vector<4x512xf32> to vector<4x256xf32>
    %21 = vector.broadcast %3 : vector<1x256xf32> to vector<4x256xf32>
    %22 = arith.mulf %20, %21 : vector<4x256xf32>
    %23 = vector.extract_strided_slice %19 {offsets = [0, 240], sizes = [4, 256], strides = [1, 1]} : vector<4x512xf32> to vector<4x256xf32>
    %24 = vector.broadcast %5 : vector<1x256xf32> to vector<4x256xf32>
    %25 = arith.mulf %23, %24 : vector<4x256xf32>
    %26 = vector.extract_strided_slice %19 {offsets = [0, 241], sizes = [4, 256], strides = [1, 1]} : vector<4x512xf32> to vector<4x256xf32>
    %27 = vector.broadcast %7 : vector<1x256xf32> to vector<4x256xf32>
    %28 = arith.mulf %26, %27 : vector<4x256xf32>
    %29 = vector.extract_strided_slice %19 {offsets = [0, 255], sizes = [4, 256], strides = [1, 1]} : vector<4x512xf32> to vector<4x256xf32>
    %30 = vector.broadcast %9 : vector<1x256xf32> to vector<4x256xf32>
    %31 = arith.mulf %29, %30 : vector<4x256xf32>
    %32 = vector.extract_strided_slice %19 {offsets = [0, 1], sizes = [4, 256], strides = [1, 1]} : vector<4x512xf32> to vector<4x256xf32>
    %33 = vector.broadcast %11 : vector<1x256xf32> to vector<4x256xf32>
    %34 = arith.mulf %32, %33 : vector<4x256xf32>
    %35 = vector.extract_strided_slice %19 {offsets = [0, 15], sizes = [4, 256], strides = [1, 1]} : vector<4x512xf32> to vector<4x256xf32>
    %36 = vector.broadcast %13 : vector<1x256xf32> to vector<4x256xf32>
    %37 = arith.mulf %35, %36 : vector<4x256xf32>
    %38 = vector.extract_strided_slice %19 {offsets = [0, 16], sizes = [4, 256], strides = [1, 1]} : vector<4x512xf32> to vector<4x256xf32>
    %39 = vector.broadcast %15 : vector<1x256xf32> to vector<4x256xf32>
    %40 = arith.mulf %38, %39 : vector<4x256xf32>
    %41 = vector.extract_strided_slice %19 {offsets = [0, 17], sizes = [4, 256], strides = [1, 1]} : vector<4x512xf32> to vector<4x256xf32>
    %42 = vector.broadcast %17 : vector<1x256xf32> to vector<4x256xf32>
    %43 = arith.mulf %41, %42 : vector<4x256xf32>
    %44 = tpu.concatenate %22, %25, %28, %31, %1, %34, %37, %40, %43 in 0 : vector<4x256xf32>, vector<4x256xf32>, vector<4x256xf32>, vector<4x256xf32>, vector<4x256xf32>, vector<4x256xf32>, vector<4x256xf32>, vector<4x256xf32>, vector<4x256xf32> -> vector<36x256xf32>
    %cst = arith.constant dense<0.000000e+00> : vector<8x256xf32>
    %45 = tpu.matmul %18, %44, %cst {dimension_numbers = #tpu.dot_dimension_numbers<[1], [0], [0], [1], [0, 0, 1, 1], [], []>} : vector<8x36xf32>, vector<36x256xf32>, vector<8x256xf32> -> vector<8x256xf32>
    %c0_21 = arith.constant 0 : index
    %c0_22 = arith.constant 0 : index
    %46 = vector.load %arg4[%c0_21, %c0_22] : memref<8x1xf32, #tpu.memory_space<vmem>>, vector<8x1xf32>
    %47 = vector.broadcast %46 : vector<8x1xf32> to vector<8x256xf32>
    %48 = arith.addf %45, %47 : vector<8x256xf32>
    %cst_23 = arith.constant 0.000000e+00 : f32
    %49 = vector.broadcast %cst_23 : f32 to vector<8x256xf32>
    %50 = arith.maximumf %48, %49 : vector<8x256xf32>
    %51 = tpu.concatenate %50, %50 in 1 : vector<8x256xf32>, vector<8x256xf32> -> vector<8x512xf32>
    %52 = vector.extract_strided_slice %51 {offsets = [0, 239], sizes = [8, 256], strides = [1, 1]} : vector<8x512xf32> to vector<8x256xf32>
    %53 = vector.broadcast %3 : vector<1x256xf32> to vector<8x256xf32>
    %54 = arith.mulf %52, %53 : vector<8x256xf32>
    %55 = vector.extract_strided_slice %51 {offsets = [0, 240], sizes = [8, 256], strides = [1, 1]} : vector<8x512xf32> to vector<8x256xf32>
    %56 = vector.broadcast %5 : vector<1x256xf32> to vector<8x256xf32>
    %57 = arith.mulf %55, %56 : vector<8x256xf32>
    %58 = vector.extract_strided_slice %51 {offsets = [0, 241], sizes = [8, 256], strides = [1, 1]} : vector<8x512xf32> to vector<8x256xf32>
    %59 = vector.broadcast %7 : vector<1x256xf32> to vector<8x256xf32>
    %60 = arith.mulf %58, %59 : vector<8x256xf32>
    %61 = vector.extract_strided_slice %51 {offsets = [0, 255], sizes = [8, 256], strides = [1, 1]} : vector<8x512xf32> to vector<8x256xf32>
    %62 = vector.broadcast %9 : vector<1x256xf32> to vector<8x256xf32>
    %63 = arith.mulf %61, %62 : vector<8x256xf32>
    %64 = vector.extract_strided_slice %51 {offsets = [0, 1], sizes = [8, 256], strides = [1, 1]} : vector<8x512xf32> to vector<8x256xf32>
    %65 = vector.broadcast %11 : vector<1x256xf32> to vector<8x256xf32>
    %66 = arith.mulf %64, %65 : vector<8x256xf32>
    %67 = vector.extract_strided_slice %51 {offsets = [0, 15], sizes = [8, 256], strides = [1, 1]} : vector<8x512xf32> to vector<8x256xf32>
    %68 = vector.broadcast %13 : vector<1x256xf32> to vector<8x256xf32>
    %69 = arith.mulf %67, %68 : vector<8x256xf32>
    %70 = vector.extract_strided_slice %51 {offsets = [0, 16], sizes = [8, 256], strides = [1, 1]} : vector<8x512xf32> to vector<8x256xf32>
    %71 = vector.broadcast %15 : vector<1x256xf32> to vector<8x256xf32>
    %72 = arith.mulf %70, %71 : vector<8x256xf32>
    %73 = vector.extract_strided_slice %51 {offsets = [0, 17], sizes = [8, 256], strides = [1, 1]} : vector<8x512xf32> to vector<8x256xf32>
    %74 = vector.broadcast %17 : vector<1x256xf32> to vector<8x256xf32>
    %75 = arith.mulf %73, %74 : vector<8x256xf32>
    %76 = tpu.concatenate %54, %57, %60, %63, %50, %66, %69, %72, %75 in 0 : vector<8x256xf32>, vector<8x256xf32>, vector<8x256xf32>, vector<8x256xf32>, vector<8x256xf32>, vector<8x256xf32>, vector<8x256xf32>, vector<8x256xf32>, vector<8x256xf32> -> vector<72x256xf32>
    %77 = tpu.concatenate %76, %1 in 0 : vector<72x256xf32>, vector<4x256xf32> -> vector<76x256xf32>
    %c0_24 = arith.constant 0 : index
    %c0_25 = arith.constant 0 : index
    %78 = vector.load %arg5[%c0_24, %c0_25] : memref<8x76xf32, #tpu.memory_space<vmem>>, vector<8x76xf32>
    %cst_26 = arith.constant dense<0.000000e+00> : vector<8x256xf32>
    %79 = tpu.matmul %78, %77, %cst_26 {dimension_numbers = #tpu.dot_dimension_numbers<[1], [0], [0], [1], [0, 0, 1, 1], [], []>} : vector<8x76xf32>, vector<76x256xf32>, vector<8x256xf32> -> vector<8x256xf32>
    %c0_27 = arith.constant 0 : index
    %c0_28 = arith.constant 0 : index
    %80 = vector.load %arg6[%c0_27, %c0_28] : memref<8x1xf32, #tpu.memory_space<vmem>>, vector<8x1xf32>
    %81 = vector.broadcast %80 : vector<8x1xf32> to vector<8x256xf32>
    %82 = arith.addf %79, %81 : vector<8x256xf32>
    %cst_29 = arith.constant 0.000000e+00 : f32
    %83 = vector.broadcast %cst_29 : f32 to vector<8x256xf32>
    %84 = arith.maximumf %82, %83 : vector<8x256xf32>
    %c0_30 = arith.constant 0 : index
    %c0_31 = arith.constant 0 : index
    %c0_32 = arith.constant 0 : index
    %85 = vector.load %arg7[%c0_30, %c0_31, %c0_32] : memref<1x8x256xf32, #tpu.memory_space<vmem>>, vector<1x8x256xf32>
    %86 = vector.shape_cast %85 : vector<1x8x256xf32> to vector<8x256xf32>
    %87 = vector.shape_cast %84 : vector<8x256xf32> to vector<1x8x256xf32>
    tpu.vector_store %arg7[%c0_30, %c0_31, %c0_32], %87 {strides = array<i32>} : memref<1x8x256xf32, #tpu.memory_space<vmem>>, vector<1x8x256xf32>,
    return
  }
  func.func @transform_0(%arg0: i32) -> (i32, i32, i32) {
    %c0_i32 = arith.constant 0 : i32
    %c0_i32_0 = arith.constant 0 : i32
    %c0_i32_1 = arith.constant 0 : i32
    return %arg0, %c0_i32, %c0_i32_0 : i32, i32, i32
  }
  func.func @transform_1(%arg0: i32) -> (i32, i32, i32) {
    %c0_i32 = arith.constant 0 : i32
    %c0_i32_0 = arith.constant 0 : i32
    %c0_i32_1 = arith.constant 0 : i32
    %c0_i32_2 = arith.constant 0 : i32
    return %c0_i32, %c0_i32_0, %c0_i32_1 : i32, i32, i32
  }
  func.func @transform_2(%arg0: i32) -> (i32, i32) {
    %c0_i32 = arith.constant 0 : i32
    %c0_i32_0 = arith.constant 0 : i32
    %c0_i32_1 = arith.constant 0 : i32
    return %c0_i32, %c0_i32_0 : i32, i32
  }
  func.func @transform_3(%arg0: i32) -> (i32, i32) {
    %c0_i32 = arith.constant 0 : i32
    %c0_i32_0 = arith.constant 0 : i32
    %c0_i32_1 = arith.constant 0 : i32
    return %c0_i32, %c0_i32_0 : i32, i32
  }
  func.func @transform_4(%arg0: i32) -> (i32, i32) {
    %c0_i32 = arith.constant 0 : i32
    %c0_i32_0 = arith.constant 0 : i32
    %c0_i32_1 = arith.constant 0 : i32
    return %c0_i32, %c0_i32_0 : i32, i32
  }
  func.func @transform_5(%arg0: i32) -> (i32, i32) {
    %c0_i32 = arith.constant 0 : i32
    %c0_i32_0 = arith.constant 0 : i32
    %c0_i32_1 = arith.constant 0 : i32
    return %c0_i32, %c0_i32_0 : i32, i32
  }
  func.func @transform_6(%arg0: i32) -> (i32, i32, i32) {
    %c0_i32 = arith.constant 0 : i32
    %c0_i32_0 = arith.constant 0 : i32
    %c0_i32_1 = arith.constant 0 : i32
    return %arg0, %c0_i32, %c0_i32_0 : i32, i32, i32
  }
}

</mosaic_0001>

<bundles_post_ra>
// kernel: tpu_custom_call.1
= control target key start
LH: loop header
LB: loop body
LE: loop exit
PB: predicated region body
PF: predicated region fallthrough
CT: control target
= control target key end

     0   :  { %11 = vsyncpa [#allocation3], 0  ;;  %s2201_s0 = inlined_call_operand.hbm [shape: f32[2,4,256], index: 0, kind: input, shape index: {}]   ;;  %s2202_s1 = inlined_call_operand.vmem [shape: f32[9,1,256], index: 1, kind: input, shape index: {}]   ;;  %s2203_s2 = inlined_call_operand.hbm [shape: f32[8,36], index: 2, kind: input, shape index: {}]   ;;  %s2204_s3 = inlined_call_operand.vmem [shape: f32[8,1], index: 3, kind: input, shape index: {}]   ;;  %s2205_s4 = inlined_call_operand.vmem [shape: f32[8,76], index: 4, kind: input, shape index: {}]   ;;  %s2206_s5 = inlined_call_operand.vmem [shape: f32[8,1], index: 5, kind: input, shape index: {}]   ;;  %s2207_s6 = inlined_call_operand.hbm [shape: f32[2,8,256], index: 6, kind: output, shape index: {}]  }
   0x1   :  { %13 = vsyncpa [#allocation3 + $0x1], 0 }
   0x2   :  { %14 = vsyncpa [#allocation6], 0 }
   0x3   :  { %15 = vsyncpa [#allocation4], 0 }
   0x4   :  { %17 = vsyncpa [#allocation4 + $0x1], 0  ;;  %s1644_s21 = smov 0   ;;  %s1646_s22 = smov 0  }
   0x5   :  { %s1648_s23 = smov 0   ;;  %s1650_s24 = smov 0  }
   0x6 LB: > { %s1665_s25 = sadd.s32 4294967295, %s1588_s24   ;;  %s1143_s26 = sadd.s32 4294967294, %s1588_s24   ;;  %s1588_s24 = sphi %s1650_s24, %s2231_s24   ;;  %s1584_s23 = sphi %s1648_s23, %s2230_s23   ;;  %s1580_s22 = sphi %s1646_s22, %s2229_s22   ;;  %s1576_s21 = sphi %s1644_s21, %s2228_s21  }
   0x7   : > { %p43_p0 = scmp.ne.s32.totalorder %s1580_s22, %s1576_s21  ;;  %p2208_p1 = scmp.eq.s32.totalorder %s1665_s25, 0 }
   0x8   : > { %p178_p3 = scmp.eq.s32.totalorder %s1143_s26, 1  ;;  %p1144_p5 = scmp.ge.s32.totalorder %s1588_s24, 1 }
   0x9   : > { %p1674_p4 = por %p2208_p1, %p43_p0  ;;  %p185_p7 = scmp.lt.s32.totalorder %s1588_s24, 3 }
   0xa   : > { %p1679_p6 = por %p178_p3, %p43_p0  ;;  %s1590_s30 = smov [#allocation5]  }
   0xb   : > { %s2211_s27 = scalar_select %p1674_p4, 1, 0 }
   0xc   : > { %s2212_s28 = scalar_select %p1679_p6, 1, 0 }
   0xd   : > { %p1684_p8 = pnand %p1144_p5, %p185_p7  ;;  %s201_s7 = sshll.u32 %s1590_s30, 4  ;;  %s202_s7 = int_to_ptr.vmem [resolvable:$true] %s201_s7 }
   0xe   : > { %s1692_s8 = sadd.s32 1, %s1588_s24   ;;  %s30_s12 = sadd.s32 1, %s1584_s23 }
   0xf   : > { %s2213_s29 = scalar_select %p1684_p8, 1, 0 }
  0x10   : > { %p1212_p10 = pneg %p1684_p8  ;;  %s27_s10 = ssub.s32 %s1588_s24, %s1692_s8 }
  0x11   : > { %p1702_p12 = scmp.eq.s32.totalorder %s27_s10, 0  ;;  %s1460_s15 = scalar_lea.hbm %s2203_s2, 128 }
  0x12   : > { %p1696_p11 = pnand %p1212_p10, %p2208_p1  ;;  %p1461_p0 = scmp.ne.s32.totalorder %s2203_s2, %s1460_s15 }
  0x13   : > { %s2215_s11 = scalar_select %p1702_p12, 1, 0 }
  0x14   : > { %p1462_p3 = pneg %p1696_p11  ;;  %p1467_p10 = scmp.lt.u32.totalorder %s1460_s15, %s2203_s2 }
  0x16   : > { %p1463_p5 = pnand %p1462_p3, %p1461_p0 }
  0x18   : > { %p1464_p7 = pneg %p1463_p5 }
  0x1a   : > { %p1469_p9 = pnand %p1467_p10, %p1464_p7 }
  0x1c   : > { %1472 = shalt.err (!%p1469_p9)
}
  0x1d   : > { %s1473_s20 = scalar_lea.vmem %s202_s7, 128  ;;  %p1481_p6 = scmp.lt.s32.totalorder %s202_s7, %s202_s7 }
  0x1e   : > { %p1474_p1 = scmp.ne.s32.totalorder %s202_s7, %s1473_s20  ;;  %p1482_p4 = scmp.lt.s32.totalorder %s1473_s20, %s1473_s20 }
  0x20   : > { %p1476_p2 = pnand %p1474_p1, %p1462_p3  ;;  %p1483_p8 = por %p1482_p4, %p1481_p6 }
  0x22   : > { %p1477_p13 = pneg %p1476_p2 }
  0x24   : > { %p1484_p12 = pnand %p1483_p8, %p1477_p13 }
  0x26   : > { %1487 = shalt.err (!%p1484_p12)
}
  0x27   : > { %1215 = dma.hbm_to_vmem [thread:$0]  (!%p1696_p11), %s2203_s2, 128, %s202_s7, [#allocation6]  }
  0x28   : > { %p2216_p1 = scmp.ne.s32.totalorder %s2215_s11, 0  ;;  %p38_p2 = scmp.eq.s32.totalorder %s1588_s24, 0 }
  0x29   : > { %p2217_p4 = scmp.ne.s32.totalorder %s1584_s23, %s1580_s22  ;;  %p2218_p6 = scmp.eq.s32.totalorder %s1665_s25, 1 }
  0x2a   : > { %s1728_s10 = scalar_select %p2216_p1, %s1584_s23, %s30_s12  }
  0x2b   : > { %p1736_p8 = por %p2218_p6, %p2217_p4  ;;  %p1225_p9 = scmp.lt.s32.totalorder %s1588_s24, 2 }
  0x2c   : > { %s221_s13 = sand.u32 1, %s1584_s23   ;;  %p2220_p12 = pmov %p2217_p4 }
  0x2d   : > { %s1147_s14 = sshll.u32 %s221_s13, 3  ;;  %s1172_s15 = sshll.u32 %s1588_s24, 7 }
  0x2e   : > { %p39_p13 = por %p38_p2, %p2220_p12  ;;  %s1749_s7 = scalar_lea.hbm %s2201_s0, %s1172_s15 }
  0x2f   : > { %s225_s11 = scalar_lea.vmem [#allocation2], %s1147_s14  ;;  %s222_s19 = scalar_lea.sflag [#allocation3], %s221_s13 }
  0x30   : > { %s233_s12 = sshll.u32 %s225_s11, 4  ;;  %p1751_p11 = pnand %p1225_p9, %p39_p13  ;;  %s1755_s12 = int_to_ptr.vmem [resolvable:$true] %s233_s12 }
  0x31   : > { %s1488_s20 = scalar_lea.hbm %s1749_s7, 128  ;;  %s1493_s14 = scalar_lea.hbm %s2201_s0, 256 }
  0x32   : > { %p1489_p0 = scmp.ne.s32.totalorder %s1749_s7, %s1488_s20  ;;  %p1490_p3 = pneg %p1751_p11 }
  0x33   : > { %p1494_p10 = scmp.lt.u32.totalorder %s1749_s7, %s2201_s0  ;;  %p1495_p1 = scmp.lt.u32.totalorder %s1493_s14, %s1488_s20 }
  0x34   : > { %p1491_p5 = pnand %p1490_p3, %p1489_p0  ;;  %p1497_p4 = scmp.lt.u32.totalorder %s1488_s20, %s1749_s7 }
  0x35   : > { %p1496_p2 = por %p1495_p1, %p1494_p10 }
  0x36   : > { %p1492_p7 = pneg %p1491_p5 }
  0x37   : > { %p1498_p6 = por %p1497_p4, %p1496_p2 }
  0x39   : > { %p1499_p9 = pnand %p1498_p6, %p1492_p7 }
  0x3b   : > { %1502 = shalt.err (!%p1499_p9)
}
  0x3c   : > { %s1503_s13 = scalar_lea.vmem %s1755_s12, 128  ;;  %s1591_s17 = smov [#allocation2]  }
  0x3d   : > { %p1504_p12 = scmp.ne.s32.totalorder %s1755_s12, %s1503_s13  ;;  %s1508_s11 = sshll.u32 %s1591_s17, 4  ;;  %s1509_s11 = int_to_ptr.vmem [resolvable:$false] %s1508_s11 }
  0x3e   : > { %s1510_s26 = scalar_lea.vmem %s1509_s11, 256  ;;  %p1511_p5 = scmp.lt.s32.totalorder %s1755_s12, %s1509_s11 }
  0x3f   : > { %p1506_p13 = pnand %p1504_p12, %p1490_p3  ;;  %p1512_p10 = scmp.lt.s32.totalorder %s1510_s26, %s1503_s13 }
  0x41   : > { %p1507_p0 = pneg %p1506_p13  ;;  %p1513_p1 = por %p1512_p10, %p1511_p5 }
  0x43   : > { %p1514_p2 = pnand %p1513_p1, %p1507_p0 }
  0x45   : > { %1517 = shalt.err (!%p1514_p2)
}
  0x46   : > { %1219 = dma.hbm_to_vmem [thread:$0]  (!%p1751_p11), %s1749_s7, 128, %s1755_s12, %s222_s19  }
  0x47   : > { %p2222_p7 = scmp.ne.s32.totalorder %s2213_s29, 0 }
  0x48   : > { %s1785_s20 = sand.u32 (!%p2222_p7), 1, %s1580_s22   ;;  %p2223_p3 = scmp.ne.s32.totalorder (!%p2222_p7), %s2211_s27, 0 }
  0x49   : > { %242 = sbr.rel (%p2222_p7) target bundleno = 1224 (0x4c8), region = 44  ;;  %s1151_s30 = sshll.u32 (!%p2222_p7), %s1785_s20, 3 }
  0x4a   : > { %s245_s14 = scalar_lea.sflag (!%p2222_p7), [#allocation3], %s1785_s20  ;;  %s1789_s15 = scalar_lea.vmem (!%p2222_p7), [#allocation2], %s1151_s30 }
  0x50   : > { %1563 = dma.done.wait (%p2223_p3), %s245_s14, 128  }
  0x51   : > { %1565 = vsyncadd (%p2223_p3), %s245_s14, 4294967168  ;;  %p2224_p11 = scmp.eq.s32.totalorder %s1665_s25, 0 }
  0x53   : > { %1567 = dma.done.wait (%p2224_p11), [#allocation6], 128   ;;  %p2225_p4 = pmov %p2224_p11 }
  0x54   : > { %v302_v0 = vlaneseq  ;;  %v1156_v4 = vld [vmem:[%s2202_s1 + $0x6] sm:$0x3]  ;;  %v1154_v5 = vld [vmem:[%s2202_s1 + $0x2] sm:$0x3]  ;;  %s1592_s27 = smov 127   ;;  %s1593_s19 = smov 112  }
  0x55   : > { %1569 = vsyncadd (%p2225_p4), [#allocation6], 4294967168  ;;  %v1155_v10 = vld [vmem:[%s2202_s1 + $0x4] sm:$0x3]  ;;  %v1157_v13 = vld [vmem:[%s2202_s1 + $0xa] sm:$0x3] }
  0x56   : > { %v303_v1 = vshrl.u32 %v302_v0, 7  ;;  %s1594_s26 = smov 113   ;;  %v1159_v16 = vld [vmem:[%s2202_s1 + $0xe] sm:$0x3]  ;;  %s1595_s29 = smov 1   ;;  %vm356_vm0 = vcmask 924672  }
  0x57   : > { %v1158_v19 = vld [vmem:[%s2202_s1 + $0xc] sm:$0x3]  ;;  %s1596_s18 = smov 16   ;;  %v1160_v22 = vld [vmem:[%s2202_s1 + $0x10] sm:$0x3]  ;;  %s1597_s17 = smov 15  }
  0x58   : > { %v304_v2 = vsub.s32 0, %v303_v1  ;;  %v308_v3 = vsub.s32 1, %v303_v1  ;;  %v282_v25 = vld [vmem:[%s2202_s1] sm:$0x3]  ;;  %s1598_s30 = smov 17   ;;  %s1599_s14 = smov 111  }
  0x59   : > { %v1828_v26 = vld [vmem:[%s1789_s15] sm:$0xff]  ;;  %s1600_s15 = smov 126   ;;  %vm335_vm1 = vcmask 916480   ;;  %vm377_vm2 = vcmask 1039360   ;;  %vm419_vm3 = vcmask 121856   ;;  %vm398_vm4 = vcmask 7168  }
  0x5a   : > { %v368_v6 = vrot.slane %v1156_v4, %v304_v2  ;;  %v326_v7 = vrot.slane %v1154_v5, %v304_v2  ;;  %v372_v8 = vrot.slane %v1156_v4, %v308_v3  ;;  %v330_v9 = vrot.slane %v1154_v5, %v308_v3  ;;  %s1602_s7 = smov 110   ;;  %s1603_s12 = smov 95  }
  0x5b   : > { %v351_v11 = vrot.slane %v1155_v10, %v308_v3  ;;  %v347_v12 = vrot.slane %v1155_v10, %v304_v2  ;;  %v393_v14 = vrot.slane %v1157_v13, %v308_v3  ;;  %v389_v15 = vrot.slane %v1157_v13, %v304_v2 }
  0x5c   : > { %373 = vrot.lane.b32.xlu1 %v368_v6, %s1592_s27  ;;  %331 = vrot.lane.b32.xlu0 %v326_v7, %s1593_s19  ;;  %v435_v17 = vrot.slane %v1159_v16, %v308_v3  ;;  %v431_v18 = vrot.slane %v1159_v16, %v304_v2  ;;  %v414_v20 = vrot.slane %v1158_v19, %v308_v3  ;;  %vm440_vm5 = vcmask 130048  }
  0x5d   : > { %v410_v21 = vrot.slane %v1158_v19, %v304_v2  ;;  %v452_v23 = vrot.slane %v1160_v22, %v304_v2  ;;  %v456_v24 = vrot.slane %v1160_v22, %v308_v3  ;;  %v305_v27 = vrot.slane %v282_v25, %v304_v2 }
  0x5e   : > { %v309_v28 = vrot.slane %v282_v25, %v308_v3  ;;  %v1834_v29 = vcombine.high %v1828_v26, %v1828_v26  ;;  %vm461_vm6 = vcmask 138240   ;;  %vm314_vm7 = vcmask 908288  }
  0x5f   : > { %vm589_vm8 = vcmask 1043456   ;;  %vm495_vm9 = vcmask 1031168   ;;  %vm538_vm10 = vcmask 900096   ;;  %vm553_vm11 = vcmask 785408  }
  0x60   : > { %375 = vrot.lane.b32.xlu1 %v372_v8, %s1592_s27  ;;  %333 = vrot.lane.b32.xlu0 %v330_v9, %s1593_s19  ;;  %v1277_v30 = vpack.i.bf16 %v1834_v29, %v1828_v26  ;;  %vm571_vm12 = vcmask 777216   ;;  %vm586_vm13 = vcmask 769024   ;;  %vm668_vm14 = vcmask 293888  }
  0x61   : > { %vm1607_vm15 = vmmov 1  }
  0x64   : > { %354 = vrot.lane.b32.xlu1 %v351_v11, %s1594_s26  ;;  %352 = vrot.lane.b32.xlu0 %v347_v12, %s1594_s26  ;;  %s1153_s26 = sshll.u32 %s1785_s20, 4 }
  0x68   : > { %396 = vrot.lane.b32.xlu1 %v393_v14, %s1595_s29  ;;  %394 = vrot.lane.b32.xlu0 %v389_v15, %s1595_s29  ;;  %s1601_s29 = smov 96  }
  0x6c   : > { %438 = vrot.lane.b32.xlu1 %v435_v17, %s1596_s18  ;;  %436 = vrot.lane.b32.xlu0 %v431_v18, %s1596_s18  ;;  %s1604_s18 = smov 94  }
  0x70   : > { %417 = vrot.lane.b32.xlu1 %v414_v20, %s1597_s17  ;;  %415 = vrot.lane.b32.xlu0 %v410_v21, %s1597_s17 }
  0x74   : > { %457 = vrot.lane.b32.xlu0 %v452_v23, %s1598_s30  ;;  %459 = vrot.lane.b32.xlu1 %v456_v24, %s1598_s30 }
  0x78   : > { %310 = vrot.lane.b32.xlu0 %v305_v27, %s1599_s14  ;;  %312 = vrot.lane.b32.xlu1 %v309_v28, %s1599_s14 }
  0x7c   : > { %1278 = vrot.lane.b32.xlu0 %v1277_v30, %s1599_s14 }
  0xce   : > { %v1841_v31 = vpop.permute.xlu1 %373  ;;  %v1843_v32 = vpop.permute.xlu0 %331 }
  0xcf   : > { %v340_v57 = vmul.f32 %v1843_v32, %v1834_v29  ;;  %v382_v1 = vmul.f32 %v1841_v31, %v1834_v29 }
  0xd1   : > { %v472_v4 = vrot.slane %v340_v57, 4  ;;  %v504_v9 = vrot.slane %v382_v1, 4 }
  0xd2   : > { %v1845_v33 = vpop.permute.xlu1 %375  ;;  %v1847_v34 = vpop.permute.xlu0 %333 }
  0xd3   : > { %v1876_v46 = vsel %vm335_vm1, %v1843_v32, %v1847_v34  ;;  %v1881_v47 = vsel %vm377_vm2, %v1841_v31, %v1845_v33  ;;  %v342_v49 = vmul.f32 %v1847_v34, %v1834_v29  ;;  %v384_v59 = vmul.f32 %v1845_v33, %v1834_v29 }
  0xd4   : > { %v341_v48 = vmul.f32 %v1876_v46, %v1828_v26  ;;  %v383_v58 = vmul.f32 %v1881_v47, %v1828_v26 }
  0xd5   : > { %v474_v62 = vrot.slane %v342_v49, 4  ;;  %v506_v6 = vrot.slane %v384_v59, 4 }
  0xd6   : > { %v1849_v35 = vpop.permute.xlu1 %354  ;;  %v1851_v36 = vpop.permute.xlu0 %352  ;;  %v473_v61 = vrot.slane %v341_v48, 4  ;;  %v505_v5 = vrot.slane %v383_v58, 4 }
  0xd7   : > { %v363_v37 = vmul.f32 %v1849_v35, %v1834_v29  ;;  %v1857_v38 = vsel %vm356_vm0, %v1851_v36, %v1849_v35  ;;  %v361_v39 = vmul.f32 %v1851_v36, %v1834_v29  ;;  %vm1199_vm0 = vmpackc.low %vm589_vm8, %vm1607_vm15 }
  0xd8   : > { %v362_v40 = vmul.f32 %v1857_v38, %v1828_v26  ;;  %v1292_v8 = vpack.i.bf16 %v474_v62, %v473_v61  ;;  %v1297_v15 = vpack.i.bf16 %v506_v6, %v505_v5 }
  0xd9   : > { %489 = vrot.lane.b32.xlu0 %v361_v39, %s1600_s15 }
  0xda   : > { %v1864_v41 = vpop.permute.xlu1 %396  ;;  %v1866_v42 = vpop.permute.xlu0 %394  ;;  %v1282_v43 = vpack.i.bf16 %v363_v37, %v362_v40 }
  0xdb   : > { %v405_v52 = vmul.f32 %v1864_v41, %v1828_v26  ;;  %v1912_v63 = vsel %vm398_vm4, %v1866_v42, %v1864_v41  ;;  %v403_v2 = vmul.f32 %v1866_v42, %v1828_v26 }
  0xdc   : > { %1283 = vrot.lane.b32.xlu1 %v1282_v43, %s1600_s15  ;;  %v404_v3 = vmul.f32 %v1912_v63, %v1834_v29 }
  0xdd   : > { %v531_v0 = vrot.slane %v405_v52, 4  ;;  %v529_v10 = vrot.slane %v403_v2, 4 }
  0xde   : > { %v1869_v44 = vpop.permute.xlu1 %438  ;;  %v1871_v45 = vpop.permute.xlu0 %436  ;;  %v530_v11 = vrot.slane %v404_v3, 4 }
  0xdf   : > { %v1924_v7 = vsel %vm440_vm5, %v1871_v45, %v1869_v44  ;;  %v445_v12 = vmul.f32 %v1871_v45, %v1828_v26  ;;  %v447_v14 = vmul.f32 %v1869_v44, %v1828_v26 }
  0xe0   : > { %v446_v13 = vmul.f32 %v1924_v7, %v1834_v29  ;;  %v1302_v20 = vpack.i.bf16 %v530_v11, %v529_v10 }
  0xe1   : > { %v562_v18 = vrot.slane %v445_v12, 4  ;;  %v564_v22 = vrot.slane %v447_v14, 4 }
  0xe2   : > { %v1887_v50 = vpop.permute.xlu1 %417  ;;  %v1889_v51 = vpop.permute.xlu0 %415  ;;  %v563_v19 = vrot.slane %v446_v13, 4 }
  0xe3   : > { %v426_v53 = vmul.f32 %v1887_v50, %v1828_v26  ;;  %v1897_v54 = vsel %vm419_vm3, %v1889_v51, %v1887_v50  ;;  %v424_v55 = vmul.f32 %v1889_v51, %v1828_v26 }
  0xe4   : > { %v425_v56 = vmul.f32 %v1897_v54, %v1834_v29  ;;  %v1307_v24 = vpack.i.bf16 %v563_v19, %v562_v18 }
  0xe5   : > { %551 = vrot.lane.b32.xlu0 %v426_v53, %s1601_s29 }
  0xe6   : > { %v1287_v60 = vpack.i.bf16 %v425_v56, %v424_v55  ;;  %v1934_v16 = vpop.permute.xlu1 %459  ;;  %v1938_v17 = vpop.permute.xlu0 %457 }
  0xe7   : > { %v1943_v21 = vsel %vm461_vm6, %v1938_v17, %v1934_v16  ;;  %v466_v25 = vmul.f32 %v1938_v17, %v1828_v26  ;;  %v468_v27 = vmul.f32 %v1934_v16, %v1828_v26 }
  0xe8   : > { %1288 = vrot.lane.b32.xlu1 %v1287_v60, %s1601_s29  ;;  %v467_v23 = vmul.f32 %v1943_v21, %v1834_v29 }
  0xe9   : > { %536 = vrot.lane.b32.xlu0 %v531_v0, %s1602_s7 }
  0xea   : > { %v1957_v28 = vpop.permute.xlu0 %310  ;;  %v1959_v37 = vpop.permute.xlu1 %312 }
  0xeb   : > { %v1966_v52 = vsel %vm314_vm7, %v1957_v28, %v1959_v37  ;;  %v321_v56 = vmul.f32 %v1959_v37, %v1834_v29  ;;  %v319_v5 = vmul.f32 %v1957_v28, %v1834_v29 }
  0xec   : > { %475 = vrot.lane.b32.xlu1 %v472_v4, %s1592_s27  ;;  %v320_v59 = vmul.f32 %v1966_v52, %v1828_v26 }
  0xed   : > { %1293 = vrot.lane.b32.xlu0 %v1292_v8, %s1592_s27 }
  0xee   : > { %v1279_v30 = vpop.permute.xlu0 %1278 }
  0xef   : > { %v1980_v10 = vunpack.i.l.bf16 %v1279_v30 }
  0xf0   : > { %507 = vrot.lane.b32.xlu1 %v504_v9, %s1593_s19  ;;  %v1978_v9 = vunpack.i.h.bf16 %v1279_v30 }
  0xf1   : > { %1298 = vrot.lane.b32.xlu0 %v1297_v15, %s1593_s19 }
  0xf4   : > { %1303 = vrot.lane.b32.xlu1 %v1302_v20, %s1602_s7 }
  0xf5   : > { %569 = vrot.lane.b32.xlu0 %v564_v22, %s1603_s12 }
  0xf8   : > { %1308 = vrot.lane.b32.xlu1 %v1307_v24, %s1603_s12 }
  0xf9   : > { %582 = vrot.lane.b32.xlu0 %v467_v23, %s1604_s18 }
  0xfc   : > { %580 = vrot.lane.b32.xlu1 %v466_v25, %s1604_s18 }
 0x100   : > { %584 = vrot.lane.b32.xlu1 %v468_v27, %s1604_s18 }
 0x14b   : > { %v490_v39 = vpop.permute.xlu0 %489 }
 0x14e   : > { %v1284_v40 = vpop.permute.xlu1 %1283 }
 0x14f   : > { %v1286_v60 = vunpack.i.h.bf16 %v1284_v40  ;;  %v1285_v61 = vunpack.i.l.bf16 %v1284_v40 }
 0x151   : > { %v496_v11 = vsel %vm495_vm9, %v490_v39, %v1285_v61  ;;  %v497_v12 = vsel %vm495_vm9, %v1285_v61, %v1286_v60 }
 0x157   : > { %v552_v43 = vpop.permute.xlu0 %551 }
 0x15a   : > { %v1961_v48 = vpop.permute.xlu1 %1288 }
 0x15b   : > { %v537_v49 = vpop.permute.xlu0 %536  ;;  %v1291_v24 = vunpack.i.h.bf16 %v1961_v48  ;;  %v1290_v25 = vunpack.i.l.bf16 %v1961_v48 }
 0x15d   : > { %v555_v61 = vsel %vm553_vm11, %v1291_v24, %v552_v43 }
 0x15e   : > { %v476_v53 = vpop.permute.xlu1 %475 }
 0x15f   : > { %v1294_v55 = vpop.permute.xlu0 %1293 }
 0x160   : > { %v1296_v57 = vunpack.i.h.bf16 %v1294_v55  ;;  %v1295_v58 = vunpack.i.l.bf16 %v1294_v55 }
 0x162   : > { %v482_v62 = vsel %vm377_vm2, %v1295_v58, %v1296_v57  ;;  %v508_v0 = vpop.permute.xlu1 %507  ;;  %v592_v1 = vsel %vm589_vm8, %v321_v56, %v1296_v57  ;;  %v481_v2 = vsel %vm377_vm2, %v476_v53, %v1295_v58  ;;  %v1998_v53 = vsel %vm314_vm7, %v1980_v10, %v1978_v9 }
 0x163   : > { %v1299_v3 = vpop.permute.xlu0 %1298  ;;  %v591_v4 = vsel %vm589_vm8, %v320_v59, %v482_v62  ;;  %v590_v18 = vsel %vm589_vm8, %v319_v5, %v481_v2  ;;  %v1605_v5 = vmov 0.0  }
 0x164   : > { %v1301_v6 = vunpack.i.h.bf16 %v1299_v3  ;;  %v1300_v8 = vunpack.i.l.bf16 %v1299_v3  ;;  %v1312_v26 = vpack.i.bf16 %v592_v1, %v591_v4  ;;  %740 = vmatprep.mubr.f32.mxu0 %v1605_v5  ;;  %1037 = vmatprep.mubr.f32.mxu1 %v1605_v5 }
 0x166   : > { %v513_v13 = vsel %vm335_vm1, %v508_v0, %v1300_v8  ;;  %v514_v14 = vsel %vm335_vm1, %v1300_v8, %v1301_v6  ;;  %v1304_v15 = vpop.permute.xlu1 %1303  ;;  %1313 = vrot.lane.b32.xlu0 %v1312_v26, %s1598_s30  ;;  %v595_v29 = vsel %vm589_vm8, %v1286_v60, %v1301_v6  ;;  %v554_v60 = vsel %vm553_vm11, %v1290_v25, %v1291_v24 }
 0x167   : > { %v1306_v19 = vunpack.i.h.bf16 %v1304_v15  ;;  %v1305_v20 = vunpack.i.l.bf16 %v1304_v15  ;;  %v594_v22 = vsel %vm589_vm8, %v497_v12, %v514_v14  ;;  %v593_v23 = vsel %vm589_vm8, %v496_v11, %v513_v13  ;;  %v602_v15 = vld [vmem:[%s2204_s3] sm:$0xff] }
 0x168   : > { %v1317_v27 = vpack.i.bf16 %v595_v29, %v594_v22  ;;  %v1322_v30 = vpack.i.bf16 %v593_v23, %v590_v18  ;;  %v1606_v11 = vmov 0  }
 0x169   : > { %v540_v39 = vsel %vm538_vm10, %v1306_v19, %v537_v49  ;;  %v539_v40 = vsel %vm538_vm10, %v1305_v20, %v1306_v19  ;;  %v570_v49 = vpop.permute.xlu0 %569  ;;  %v596_v8 = vsel %vm589_vm8, %v1980_v10, %v1305_v20  ;;  %1342 = vset.pattern.permute.xlu1 %v1606_v11  ;;  %1458 = vset.pattern.permute.xlu0 %v1606_v11 }
 0x16a   : > { %1318 = vrot.lane.b32.xlu1 %v1317_v27, %s1598_s30  ;;  %v1309_v55 = vpop.permute.xlu1 %1308  ;;  %1323 = vrot.lane.b32.xlu0 %v1322_v30, %s1598_s30  ;;  %v597_v48 = vsel %vm589_vm8, %v1998_v53, %v539_v40  ;;  %v598_v56 = vsel %vm589_vm8, %v1978_v9, %v540_v39 }
 0x16b   : > { %v1311_v57 = vunpack.i.h.bf16 %v1309_v55  ;;  %v1310_v58 = vunpack.i.l.bf16 %v1309_v55  ;;  %v1327_v59 = vpack.i.bf16 %v598_v56, %v597_v48 }
 0x16d   : > { %v573_v62 = vsel %vm571_vm12, %v1311_v57, %v570_v49  ;;  %v572_v0 = vsel %vm571_vm12, %v1310_v58, %v1311_v57  ;;  %v599_v1 = vsel %vm589_vm8, %v1290_v25, %v1310_v58  ;;  %v583_v43 = vpop.permute.xlu0 %582 }
 0x16e   : > { %1328 = vrot.lane.b32.xlu1 %v1327_v59, %s1598_s30  ;;  %v581_v2 = vpop.permute.xlu1 %580  ;;  %v600_v3 = vsel %vm589_vm8, %v554_v60, %v572_v0  ;;  %v601_v4 = vsel %vm589_vm8, %v555_v61, %v573_v62  ;;  %v1332_v26 = vpack.i.bf16 %v599_v1, %v596_v8 }
 0x16f   : > { %v1337_v6 = vpack.i.bf16 %v601_v4, %v600_v3  ;;  %v587_v13 = vsel %vm586_vm13, %v581_v2, %v583_v43 }
 0x171   : > { %1338 = vrot.lane.b32.xlu0 %v1337_v6, %s1598_s30 }
 0x172   : > { %1333 = vrot.lane.b32.xlu1 %v1332_v26, %s1598_s30  ;;  %v585_v12 = vpop.permute.xlu1 %584 }
 0x173   : > { %v588_v14 = vsel %vm586_vm13, %v583_v43, %v585_v12 }
 0x175   : > { %646 = vrot.lane.b32.xlu0 %v587_v13, %s1598_s30 }
 0x176   : > { %648 = vrot.lane.b32.xlu1 %v588_v14, %s1598_s30  ;;  %v297_v14 = vld [vmem:[#allocation5] sm:$0xff] }
 0x179   : > { %644 = vrot.lane.b32.xlu0 %v581_v2, %s1598_s30 }
 0x17a   : > { %605 = vperm.xlu1 %1342, %v602_v15  }
 0x1d8   : > { %v1314_v29 = vpop.permute.xlu0 %1313 }
 0x1d9   : > { %v1316_v18 = vunpack.i.h.bf16 %v1314_v29  ;;  %v1315_v19 = vunpack.i.l.bf16 %v1314_v29 }
 0x1db   : > { %v651_v30 = vsel %vm461_vm6, %v1315_v19, %v1316_v18 }
 0x1dc   : > { %v1319_v20 = vpop.permute.xlu1 %1318  ;;  %v1324_v22 = vpop.permute.xlu0 %1323 }
 0x1dd   : > { %v1321_v23 = vunpack.i.h.bf16 %v1319_v20  ;;  %v1320_v24 = vunpack.i.l.bf16 %v1319_v20  ;;  %v1326_v25 = vunpack.i.h.bf16 %v1324_v22  ;;  %v1325_v27 = vunpack.i.l.bf16 %v1324_v22 }
 0x1df   : > { %v653_v39 = vsel %vm461_vm6, %v1320_v24, %v1321_v23  ;;  %v650_v40 = vsel %vm461_vm6, %v1325_v27, %v1315_v19  ;;  %v652_v55 = vsel %vm461_vm6, %v1326_v25, %v1320_v24 }
 0x1e0   : > { %v1329_v48 = vpop.permute.xlu1 %1328  ;;  %v1174_v56 = vpack.c.bf16 %v653_v39, %v651_v30  ;;  %v1176_v49 = vpack.c.bf16 %v652_v55, %v650_v40 }
 0x1e1   : > { %v1331_v57 = vunpack.i.h.bf16 %v1329_v48  ;;  %v1330_v58 = vunpack.i.l.bf16 %v1329_v48 }
 0x1e2   : > { %1175 = vmatprep.subr.bf16.mxu0 %v1174_v56 }
 0x1e3   : > { %v1339_v59 = vpop.permute.xlu0 %1338  ;;  %1177 = vmatpush1.bf16.msra.mxu0 %v1176_v49  ;;  %v655_v2 = vsel %vm461_vm6, %v1330_v58, %v1331_v57 }
 0x1e4   : > { %v1341_v60 = vunpack.i.h.bf16 %v1339_v59  ;;  %v1340_v61 = vunpack.i.l.bf16 %v1339_v59  ;;  %v1334_v62 = vpop.permute.xlu1 %1333 }
 0x1e5   : > { %v1336_v0 = vunpack.i.h.bf16 %v1334_v62  ;;  %v1335_v1 = vunpack.i.l.bf16 %v1334_v62 }
 0x1e6   : > { %v657_v3 = vsel %vm461_vm6, %v1340_v61, %v1341_v60 }
 0x1e7   : > { %v647_v4 = vpop.permute.xlu0 %646  ;;  %v1178_v5 = vpack.c.bf16 %v657_v3, %v655_v2  ;;  %v654_v6 = vsel %vm461_vm6, %v1335_v1, %v1330_v58  ;;  %v656_v8 = vsel %vm461_vm6, %v1336_v0, %v1340_v61 }
 0x1e8   : > { %v649_v43 = vpop.permute.xlu1 %648  ;;  %v1180_v26 = vpack.c.bf16 %v656_v8, %v654_v6 }
 0x1e9   : > { %v659_v11 = vsel %vm461_vm6, %v647_v4, %v649_v43  ;;  %1179 = vmatprep.subr.bf16.mxu0 %v1178_v5 }
 0x1ea   : > { %1181 = vmatpush1.bf16.msra.mxu0 %v1180_v26 }
 0x1eb   : > { %v645_v12 = vpop.permute.xlu0 %644  ;;  %1161 = vmatprep.subr.msk.mxu0 %vm589_vm8, %v659_v11 }
 0x1ec   : > { %v658_v13 = vsel %vm461_vm6, %v645_v12, %v647_v4 }
 0x1ee   : > { %1162 = vmatpush1.msk.msra.mxu0 %vm589_vm8, %v658_v13 }
 0x1ef   : > { %1163 = vmatmul.mubr.msk.f32.vlgmr.msra.gmra.mrb[0].mxu0 %vm668_vm14, %v297_v14 }
 0x1f9   : > { %v606_v15 = vpop.permute.xlu1 %605 }
 0x2c2   : > { %v742_v29 = vpop.f32.mrb[0].mxu0 }
 0x2c3   : > { %v743_v18 = vadd.f32 %v742_v29, %v606_v15  ;;  %v744_v19 = vpop.f32.mrb[1].mxu0 }
 0x2c4   : > { %v745_v20 = vadd.f32 %v744_v19, %v606_v15 }
 0x2c5   : > { %v747_v22 = vmax.f32 %v743_v18, 0.0 }
 0x2c6   : > { %v2038_v23 = vmax.f32 %v745_v20, 0.0 }
 0x2c7   : > { %v759_v24 = vmul.f32 %v747_v22, %v1881_v47  ;;  %v753_v25 = vmul.f32 %v747_v22, %v1876_v46  ;;  %v761_v27 = vmul.f32 %v747_v22, %v1866_v42  ;;  %v756_v47 = vmul.f32 %v747_v22, %v1857_v38 }
 0x2c8   : > { %v752_v30 = vmul.f32 %v2038_v23, %v1843_v32  ;;  %v1343_v39 = vpack.i.bf16 %v2038_v23, %v747_v22  ;;  %v760_v40 = vmul.f32 %v2038_v23, %v1845_v33  ;;  %v754_v55 = vmul.f32 %v2038_v23, %v1847_v34 }
 0x2c9   : > { %v762_v48 = vmul.f32 %v2038_v23, %v1912_v63  ;;  %v757_v46 = vmul.f32 %v2038_v23, %v1849_v35  ;;  %v764_v42 = vmul.f32 %v747_v22, %v1889_v51  ;;  %v765_v33 = vmul.f32 %v2038_v23, %v1897_v54 }
 0x2ca   : > { %776 = vrot.lane.b32.xlu1 %v752_v30, %s1592_s27  ;;  %1344 = vrot.lane.b32.xlu0 %v1343_v39, %s1599_s14  ;;  %v1358_v32 = vpack.i.bf16 %v760_v40, %v759_v24  ;;  %v1348_v56 = vpack.i.bf16 %v754_v55, %v753_v25  ;;  %v763_v63 = vmul.f32 %v747_v22, %v1864_v41  ;;  %s280_s14 = scalar_lea.vmem [#allocation7], %s1153_s26 }
 0x2cb   : > { %v1363_v34 = vpack.i.bf16 %v762_v48, %v761_v27  ;;  %v1353_v49 = vpack.i.bf16 %v757_v46, %v756_v47  ;;  %v1368_v57 = vpack.i.bf16 %v765_v33, %v764_v42  ;;  %v767_v38 = vmul.f32 %v747_v22, %v1871_v45 }
 0x2cc   : > { %v768_v35 = vmul.f32 %v2038_v23, %v1924_v7  ;;  %v770_v58 = vmul.f32 %v747_v22, %v1938_v17  ;;  %v771_v59 = vmul.f32 %v2038_v23, %v1943_v21  ;;  %v750_v54 = vmul.f32 %v747_v22, %v1966_v52 }
 0x2cd   : > { %v751_v41 = vmul.f32 %v2038_v23, %v1959_v37  ;;  %v758_v45 = vmul.f32 %v2038_v23, %v1841_v31  ;;  %v755_v17 = vmul.f32 %v2038_v23, %v1851_v36  ;;  %v766_v21 = vmul.f32 %v747_v22, %v1887_v50 }
 0x2ce   : > { %820 = vrot.lane.b32.xlu0 %v763_v63, %s1602_s7  ;;  %1359 = vrot.lane.b32.xlu1 %v1358_v32, %s1593_s19  ;;  %v1373_v51 = vpack.i.bf16 %v768_v35, %v767_v38  ;;  %v1378_v60 = vpack.i.bf16 %v771_v59, %v770_v58  ;;  %v769_v31 = vmul.f32 %v747_v22, %v1869_v44 }
 0x2cf   : > { %v1383_v7 = vpack.i.bf16 %v751_v41, %v750_v54  ;;  %v772_v37 = vmul.f32 %v747_v22, %v1934_v16  ;;  %v749_v8 = vmul.f32 %v2038_v23, %v1957_v28 }
 0x2d2   : > { %798 = vrot.lane.b32.xlu1 %v758_v45, %s1593_s19  ;;  %1349 = vrot.lane.b32.xlu0 %v1348_v56, %s1592_s27 }
 0x2d6   : > { %1364 = vrot.lane.b32.xlu1 %v1363_v34, %s1602_s7  ;;  %1354 = vrot.lane.b32.xlu0 %v1353_v49, %s1600_s15 }
 0x2da   : > { %1369 = vrot.lane.b32.xlu1 %v1368_v57, %s1601_s29  ;;  %787 = vrot.lane.b32.xlu0 %v755_v17, %s1600_s15  ;;  %s1063_s15 = sshll.u32 %s280_s14, 4  ;;  %s2159_s15 = int_to_ptr.vmem [resolvable:$true] %s1063_s15 }
 0x2db   : > { %s1518_s16 = scalar_lea.vmem %s2159_s15, 256 }
 0x2dc   : > { %p1519_p6 = scmp.ne.s32.totalorder %s2159_s15, %s1518_s16 }
 0x2de   : > { %1374 = vrot.lane.b32.xlu1 %v1373_v51, %s1603_s12  ;;  %831 = vrot.lane.b32.xlu0 %v766_v21, %s1601_s29  ;;  %p1520_p9 = pnand %p1519_p6, %p1736_p8 }
 0x2e0   : > { %p1521_p12 = pneg %p1520_p9 }
 0x2e2   : > { %1379 = vrot.lane.b32.xlu1 %v1378_v60, %s1604_s18  ;;  %842 = vrot.lane.b32.xlu0 %v769_v31, %s1603_s12 }
 0x2e6   : > { %853 = vrot.lane.b32.xlu0 %v772_v37, %s1604_s18  ;;  %1384 = vrot.lane.b32.xlu1 %v1383_v7, %s1598_s30  ;;  %v1438_v37 = vpack.i.bf16 %v1978_v9, %v1998_v53  ;;  %s1049_s18 = scalar_lea.sflag [#allocation4], %s1785_s20 }
 0x33c   : > { %v777_v36 = vpop.permute.xlu1 %776  ;;  %v1345_v52 = vpop.permute.xlu0 %1344 }
 0x33d   : > { %v1347_v61 = vunpack.i.h.bf16 %v1345_v52  ;;  %v1346_v50 = vunpack.i.l.bf16 %v1345_v52 }
 0x33f   : > { %v812_v62 = vsel %vm314_vm7, %v1346_v50, %v1347_v61 }
 0x340   : > { %v1388_v0 = vpack.i.bf16 %v1347_v61, %v812_v62  ;;  %v821_v1 = vpop.permute.xlu0 %820  ;;  %v1360_v2 = vpop.permute.xlu1 %1359 }
 0x341   : > { %v1362_v4 = vunpack.i.h.bf16 %v1360_v2  ;;  %v1361_v5 = vunpack.i.l.bf16 %v1360_v2 }
 0x342   : > { %1389 = vrot.lane.b32.xlu1 %v1388_v0, %s1598_s30 }
 0x343   : > { %v805_v15 = vsel %vm335_vm1, %v1361_v5, %v1362_v4 }
 0x344   : > { %v799_v44 = vpop.permute.xlu1 %798  ;;  %v1350_v3 = vpop.permute.xlu0 %1349  ;;  %v1408_v20 = vpack.i.bf16 %v1362_v4, %v805_v15 }
 0x345   : > { %v1352_v16 = vunpack.i.h.bf16 %v1350_v3  ;;  %v1351_v6 = vunpack.i.l.bf16 %v1350_v3  ;;  %v804_v63 = vsel %vm335_vm1, %v799_v44, %v1361_v5  ;;  %vm965_vm1 = vcmask 621568  }
 0x347   : > { %v783_v43 = vsel %vm377_vm2, %v1351_v6, %v1352_v16  ;;  %v782_v26 = vsel %vm377_vm2, %v777_v36, %v1351_v6  ;;  %v858_v36 = vld [vmem:[%s2206_s5] sm:$0xff] }
 0x348   : > { %v1393_v11 = vpack.i.bf16 %v1352_v16, %v783_v43  ;;  %v1365_v12 = vpop.permute.xlu1 %1364  ;;  %v1355_v13 = vpop.permute.xlu0 %1354  ;;  %v1398_v14 = vpack.i.bf16 %v782_v26, %v749_v8 }
 0x349   : > { %v1357_v29 = vunpack.i.h.bf16 %v1355_v13  ;;  %v1356_v18 = vunpack.i.l.bf16 %v1355_v13  ;;  %v1366_v28 = vunpack.i.l.bf16 %v1365_v12  ;;  %v1367_v47 = vunpack.i.h.bf16 %v1365_v12 }
 0x34a   : > { %1394 = vrot.lane.b32.xlu0 %v1393_v11, %s1598_s30  ;;  %1399 = vrot.lane.b32.xlu1 %v1398_v14, %s1598_s30 }
 0x34b   : > { %v794_v19 = vsel %vm495_vm9, %v1356_v18, %v1357_v29  ;;  %v1413_v25 = vpack.i.bf16 %v1366_v28, %v1346_v50  ;;  %v822_v58 = vsel %vm538_vm10, %v1366_v28, %v1367_v47  ;;  %v823_v59 = vsel %vm538_vm10, %v1367_v47, %v821_v1 }
 0x34c   : > { %v1403_v22 = vpack.i.bf16 %v1357_v29, %v794_v19  ;;  %v1370_v23 = vpop.permute.xlu1 %1369  ;;  %v788_v24 = vpop.permute.xlu0 %787  ;;  %v1428_v45 = vpack.i.bf16 %v823_v59, %v822_v58 }
 0x34d   : > { %v1371_v39 = vunpack.i.l.bf16 %v1370_v23  ;;  %v793_v46 = vsel %vm495_vm9, %v788_v24, %v1356_v18  ;;  %v1372_v41 = vunpack.i.h.bf16 %v1370_v23 }
 0x34e   : > { %1404 = vrot.lane.b32.xlu0 %v1403_v22, %s1598_s30  ;;  %1409 = vrot.lane.b32.xlu1 %v1408_v20, %s1598_s30  ;;  %v1423_v38 = vpack.i.bf16 %v804_v63, %v793_v46 }
 0x34f   : > { %v833_v17 = vsel %vm553_vm11, %v1371_v39, %v1372_v41 }
 0x350   : > { %v1375_v27 = vpop.permute.xlu1 %1374  ;;  %v832_v30 = vpop.permute.xlu0 %831 }
 0x351   : > { %v1377_v40 = vunpack.i.h.bf16 %v1375_v27  ;;  %v1376_v55 = vunpack.i.l.bf16 %v1375_v27  ;;  %v834_v7 = vsel %vm553_vm11, %v1372_v41, %v832_v30 }
 0x352   : > { %1414 = vrot.lane.b32.xlu1 %v1413_v25, %s1598_s30  ;;  %v1433_v31 = vpack.i.bf16 %v834_v7, %v833_v17 }
 0x353   : > { %v1418_v48 = vpack.i.bf16 %v1376_v55, %v1371_v39  ;;  %v844_v34 = vsel %vm571_vm12, %v1376_v55, %v1377_v40 }
 0x354   : > { %v1380_v32 = vpop.permute.xlu1 %1379  ;;  %v843_v42 = vpop.permute.xlu0 %842 }
 0x355   : > { %v1382_v33 = vunpack.i.h.bf16 %v1380_v32  ;;  %v1381_v56 = vunpack.i.l.bf16 %v1380_v32  ;;  %v845_v49 = vsel %vm571_vm12, %v1377_v40, %v843_v42  ;;  %1419 = vrot.lane.b32.xlu0 %v1418_v48, %s1598_s30 }
 0x356   : > { %v1443_v57 = vpack.i.bf16 %v845_v49, %v844_v34 }
 0x357   : > { %v855_v51 = vsel %vm586_vm13, %v1381_v56, %v1382_v33  ;;  %v1453_v21 = vpack.i.bf16 %v1980_v10, %v1381_v56 }
 0x358   : > { %v854_v35 = vpop.permute.xlu0 %853  ;;  %1444 = vrot.lane.b32.xlu1 %v1443_v57, %s1598_s30  ;;  %v1385_v52 = vpop.permute.xlu1 %1384 }
 0x359   : > { %v856_v54 = vsel %vm586_vm13, %v1382_v33, %v854_v35  ;;  %1424 = vrot.lane.b32.xlu0 %v1423_v38, %s1598_s30  ;;  %v1387_v50 = vunpack.i.h.bf16 %v1385_v52  ;;  %v1386_v62 = vunpack.i.l.bf16 %v1385_v52 }
 0x35a   : > { %v1448_v60 = vpack.i.bf16 %v856_v54, %v855_v51 }
 0x35b   : > { %v928_v4 = vsel %vm461_vm6, %v1386_v62, %v1387_v50 }
 0x35c   : > { %1449 = vrot.lane.b32.xlu1 %v1448_v60, %s1598_s30 }
 0x35d   : > { %1429 = vrot.lane.b32.xlu0 %v1428_v45, %s1598_s30 }
 0x360   : > { %1454 = vrot.lane.b32.xlu1 %v1453_v21, %s1598_s30 }
 0x361   : > { %1434 = vrot.lane.b32.xlu0 %v1433_v31, %s1598_s30 }
 0x365   : > { %1439 = vrot.lane.b32.xlu0 %v1438_v37, %s1598_s30  ;;  %s1173_s30 = sshll.u32 %s1665_s25, 8  ;;  %s1608_s25 = smov [#allocation7]  }
 0x366   : > { %s2157_s12 = scalar_lea.hbm %s2207_s6, %s1173_s30  ;;  %s1522_s13 = sshll.u32 %s1608_s25, 4  ;;  %s1523_s13 = int_to_ptr.vmem [resolvable:$false] %s1522_s13 }
 0x367   : > { %s1524_s27 = scalar_lea.vmem %s1523_s13, 512  ;;  %p1525_p13 = scmp.lt.s32.totalorder %s2159_s15, %s1523_s13 }
 0x368   : > { %p1526_p0 = scmp.lt.s32.totalorder %s1524_s27, %s1518_s16 }
 0x369   : > { %861 = vperm.xlu0 %1458, %v858_v36  }
 0x36a   : > { %p1527_p5 = por %p1526_p0, %p1525_p13 }
 0x36c   : > { %p1528_p10 = pnand %p1527_p5, %p1521_p12 }
 0x3b4   : > { %v1390_v61 = vpop.permute.xlu1 %1389 }
 0x3b5   : > { %v1392_v24 = vunpack.i.h.bf16 %v1390_v61  ;;  %v1391_v25 = vunpack.i.l.bf16 %v1390_v61 }
 0x3b7   : > { %v936_v56 = vsel %vm461_vm6, %v1391_v25, %v1392_v24 }
 0x3bc   : > { %v1395_v10 = vpop.permute.xlu0 %1394  ;;  %v1400_v0 = vpop.permute.xlu1 %1399 }
 0x3bd   : > { %v1397_v1 = vunpack.i.h.bf16 %v1395_v10  ;;  %v1396_v2 = vunpack.i.l.bf16 %v1395_v10  ;;  %v1402_v44 = vunpack.i.h.bf16 %v1400_v0  ;;  %v1401_v3 = vunpack.i.l.bf16 %v1400_v0 }
 0x3bf   : > { %v930_v9 = vsel %vm461_vm6, %v1396_v2, %v1397_v1  ;;  %v927_v53 = vsel %vm461_vm6, %v1401_v3, %v1386_v62  ;;  %v929_v5 = vsel %vm461_vm6, %v1402_v44, %v1396_v2 }
 0x3c0   : > { %v1405_v16 = vpop.permute.xlu0 %1404  ;;  %v1410_v6 = vpop.permute.xlu1 %1409  ;;  %v1182_v8 = vpack.c.bf16 %v930_v9, %v928_v4  ;;  %v1184_v43 = vpack.c.bf16 %v929_v5, %v927_v53  ;;  %v857_v9 = vld [vmem:[%s2205_s4] sm:$0xff] }
 0x3c1   : > { %v1407_v26 = vunpack.i.h.bf16 %v1405_v16  ;;  %v1406_v11 = vunpack.i.l.bf16 %v1405_v16  ;;  %v1412_v12 = vunpack.i.h.bf16 %v1410_v6  ;;  %v1411_v13 = vunpack.i.l.bf16 %v1410_v6 }
 0x3c2   : > { %1183 = vmatprep.subr.bf16.mxu1 %v1182_v8 }
 0x3c3   : > { %1185 = vmatpush1.bf16.msra.mxu1 %v1184_v43  ;;  %v932_v14 = vsel %vm461_vm6, %v1406_v11, %v1407_v26  ;;  %v934_v15 = vsel %vm461_vm6, %v1411_v13, %v1412_v12 }
 0x3c4   : > { %v1186_v29 = vpack.c.bf16 %v934_v15, %v932_v14  ;;  %v1415_v18 = vpop.permute.xlu1 %1414 }
 0x3c5   : > { %v1416_v27 = vunpack.i.l.bf16 %v1415_v18  ;;  %v1417_v47 = vunpack.i.h.bf16 %v1415_v18 }
 0x3c6   : > { %1187 = vmatprep.subr.bf16.mxu1 %v1186_v29 }
 0x3c7   : > { %v1420_v19 = vpop.permute.xlu0 %1419  ;;  %v935_v49 = vsel %vm461_vm6, %v1416_v27, %v1391_v25 }
 0x3c8   : > { %v1422_v57 = vunpack.i.h.bf16 %v1420_v19  ;;  %v1421_v51 = vunpack.i.l.bf16 %v1420_v19 }
 0x3ca   : > { %v1445_v20 = vpop.permute.xlu1 %1444 }
 0x3cb   : > { %v1425_v28 = vpop.permute.xlu0 %1424  ;;  %v1447_v42 = vunpack.i.h.bf16 %v1445_v20  ;;  %v1446_v33 = vunpack.i.l.bf16 %v1445_v20 }
 0x3cc   : > { %v1427_v22 = vunpack.i.h.bf16 %v1425_v28  ;;  %v1426_v23 = vunpack.i.l.bf16 %v1425_v28 }
 0x3cd   : > { %v942_v45 = vsel %vm461_vm6, %v1446_v33, %v1447_v42  ;;  %v941_v7 = vsel %vm461_vm6, %v1422_v57, %v1446_v33 }
 0x3ce   : > { %v1450_v30 = vpop.permute.xlu1 %1449  ;;  %v931_v39 = vsel %vm461_vm6, %v1426_v23, %v1406_v11  ;;  %v933_v40 = vsel %vm461_vm6, %v1427_v22, %v1411_v13 }
 0x3cf   : > { %v1430_v55 = vpop.permute.xlu0 %1429  ;;  %v1188_v48 = vpack.c.bf16 %v933_v40, %v931_v39  ;;  %v1452_v60 = vunpack.i.h.bf16 %v1450_v30  ;;  %v1451_v17 = vunpack.i.l.bf16 %v1450_v30 }
 0x3d0   : > { %v1432_v46 = vunpack.i.h.bf16 %v1430_v55  ;;  %v1431_v32 = vunpack.i.l.bf16 %v1430_v55 }
 0x3d1   : > { %1189 = vmatpush1.bf16.msra.mxu1 %v1188_v48  ;;  %v944_v0 = vsel %vm461_vm6, %v1451_v17, %v1452_v60 }
 0x3d2   : > { %v938_v34 = vsel %vm461_vm6, %v1431_v32, %v1432_v46  ;;  %v937_v63 = vsel %vm461_vm6, %v1417_v47, %v1431_v32  ;;  %v1455_v38 = vpop.permute.xlu1 %1454 }
 0x3d3   : > { %v1435_v35 = vpop.permute.xlu0 %1434  ;;  %v1190_v58 = vpack.c.bf16 %v938_v34, %v936_v56  ;;  %v1192_v59 = vpack.c.bf16 %v937_v63, %v935_v49  ;;  %v1456_v21 = vunpack.i.l.bf16 %v1455_v38  ;;  %v1457_v50 = vunpack.i.h.bf16 %v1455_v38 }
 0x3d4   : > { %v1437_v54 = vunpack.i.h.bf16 %v1435_v35  ;;  %v1436_v41 = vunpack.i.l.bf16 %v1435_v35 }
 0x3d5   : > { %1191 = vmatprep.subr.bf16.mxu1 %v1190_v58  ;;  %v943_v1 = vsel %vm461_vm6, %v1456_v21, %v1451_v17 }
 0x3d6   : > { %1193 = vmatpush1.bf16.msra.mxu1 %v1192_v59  ;;  %v940_v31 = vsel %vm461_vm6, %v1436_v41, %v1437_v54  ;;  %v939_v37 = vsel %vm461_vm6, %v1421_v51, %v1436_v41 }
 0x3d7   : > { %v1440_v36 = vpop.permute.xlu0 %1439  ;;  %v1194_v52 = vpack.c.bf16 %v942_v45, %v940_v31  ;;  %v1196_v61 = vpack.c.bf16 %v941_v7, %v939_v37 }
 0x3d8   : > { %v1442_v62 = vunpack.i.h.bf16 %v1440_v36  ;;  %v1441_v10 = vunpack.i.l.bf16 %v1440_v36 }
 0x3d9   : > { %1195 = vmatprep.subr.bf16.mxu1 %v1194_v52 }
 0x3da   : > { %v945_v2 = vsel %vm461_vm6, %v1457_v50, %v1441_v10  ;;  %v946_v44 = vsel %vm461_vm6, %v1441_v10, %v1442_v62  ;;  %1197 = vmatpush1.bf16.msra.mxu1 %v1196_v61 }
 0x3db   : > { %v1198_v3 = vpack.c.bf16 %v946_v44, %v944_v0  ;;  %v1201_v4 = vpack.c.bf16 %v945_v2, %v943_v1 }
 0x3dd   : > { %1200 = vmatprep.subr.msk.bf16.mxu1 %vm1199_vm0, %v1198_v3 }
 0x3de   : > { %1203 = vmatpush1.bf16.msk.msra.mxu1 %vm1199_vm0, %v1201_v4 }
 0x3e1   : > { %1166 = vmatmul.mubr.msk.f32.vlgmr.msra.gmra.mrb[0].mxu1 %vm965_vm1, %v857_v9 }
 0x3e8   : > { %v862_v53 = vpop.permute.xlu0 %861 }
 0x4b4   : > { %v1039_v5 = vpop.f32.mrb[0].mxu1 }
 0x4b5   : > { %v1040_v16 = vadd.f32 %v1039_v5, %v862_v53  ;;  %v1041_v6 = vpop.f32.mrb[1].mxu1 }
 0x4b6   : > { %v1042_v8 = vadd.f32 %v1041_v6, %v862_v53 }
 0x4b7   : > { %v1044_v43 = vmax.f32 %v1040_v16, 0.0 }
 0x4b8   : > { %v1045_v26 = vmax.f32 %v1042_v8, 0.0 }
 0x4b9   : > { %1046 = vst [vmem:[%s280_s14] sm:$0xff] %v1044_v43 }
 0x4ba   : > { %1047 = vst [vmem:[%s280_s14 + $0x8] sm:$0xff] %v1045_v26 }
 0x4bb   : > { %1531 = shalt.err (!%p1528_p10)
}
 0x4bc   : > { %s1532_s20 = scalar_lea.hbm %s2157_s12, 256  ;;  %s1536_s11 = scalar_lea.hbm %s2207_s6, 512 }
 0x4bd   : > { %p1533_p1 = scmp.ne.s32.totalorder %s2157_s12, %s1532_s20  ;;  %p1537_p3 = scmp.lt.u32.totalorder %s2157_s12, %s2207_s6 }
 0x4be   : > { %p1538_p11 = scmp.lt.u32.totalorder %s1536_s11, %s1532_s20  ;;  %p1540_p6 = scmp.lt.u32.totalorder %s1532_s20, %s2157_s12 }
 0x4bf   : > { %p1534_p2 = pnand %p1533_p1, %p1736_p8 }
 0x4c0   : > { %p1539_p4 = por %p1538_p11, %p1537_p3 }
 0x4c1   : > { %p1535_p7 = pneg %p1534_p2 }
 0x4c2   : > { %p1541_p9 = por %p1540_p6, %p1539_p4 }
 0x4c4   : > { %p1542_p12 = pnand %p1541_p9, %p1535_p7 }
 0x4c6   : > { %1545 = shalt.err (!%p1542_p12)
}
 0x4c7   : > { %1210 = dma.vmem_to_hbm [thread:$0]  (%p1736_p8), %s2159_s15, 256, %s2157_s12, %s1049_s18  }
 0x4c8 PF: > { %s1075_s14 = sand.u32 1, %s1576_s21   ;;  %p2226_p13 = scmp.ne.s32.totalorder %s2212_s28, 0 }
 0x4c9   : > { %p2227_p0 = scmp.ge.s32.totalorder %s1588_s24, 2  ;;  %s1076_s29 = scalar_lea.sflag [#allocation4], %s1075_s14 }
 0x4cb   : > { %p1221_p5 = pnand %p2227_p0, %p2226_p13 }
 0x4cd   : > { %1571 = dma.done.wait (!%p1221_p5), %s1076_s29, 256  }
 0x4ce   : > { %1573 = vsyncadd (!%p1221_p5), %s1076_s29, 4294967040  ;;  %p20_p10 = scmp.ge.s32.totalorder %s1692_s8, 4   ;;  %s2228_s21 = smov %s1580_s22 }
 0x4cf   : > { %s2229_s22 = smov %s1584_s23  ;;  %s2230_s23 = smov %s1728_s10 }
 0x4d0   : > { %s2231_s24 = smov %s1692_s8  ;;  %22 = sbr.rel (!%p20_p10) target bundleno = 6 (0x6), region = 100 }
 0x4d7   :  { %1081 = vsyncpa [#allocation3], 1 }
 0x4d8   :  { %1083 = vsyncpa [#allocation3 + $0x1], 1 }
 0x4d9   :  { %1084 = vsyncpa [#allocation6], 1 }
 0x4da   :  { %1085 = vsyncpa [#allocation4], 1 }
 0x4db   :  { %1087 = vsyncpa [#allocation4 + $0x1], 1 }

</bundles_post_ra>
